<compile_context>
chip_gen: v5e
topology: v5e:2x2
jax: 0.10.0
libtpu: 0.0.40
codegen_flags: <defaults>
</compile_context>

<pallas_src>
import jax
import jax.numpy as jnp
from jax.experimental import pallas as pl
from jax.experimental.pallas import tpu as pltpu


def _round_up(x: int, m: int) -> int:
    return (x + m - 1) // m * m


def _vmem_budget_bytes() -> int:
    """Per-generation VMEM budget: ~85% of physical, capped at 110 MiB.

    v7x (64 MiB physical)  -> ~54 MiB (headroom for compiler scratch)
    v5e/v6e (128 MiB)      -> ~108 MiB (don't throttle at 64 MiB)
    Fallback (unknown)     -> ~54 MiB (safe everywhere)
    """
    cap = 64 << 20
    try:
        info = pltpu.get_tpu_info()
        cap = int(getattr(info, "vmem_capacity_bytes", cap))
    except Exception:
        pass
    return int(min(cap * 0.85, 110 << 20))


def prepare_flow_theory(w_mean, b_mean, w_logvar, b_logvar, *, use_bf16: bool = True):
    """Fuse the two Linear heads ONCE, ahead of the forward path.

    w_*: (D_in, D_out) (transposed vs. torch Linear.weight), b_*: (D_out,).
    Pads K (D_in) and N (2*D_out) to multiples of 128 for lane-dense loads /
    unmasked stores, and casts the fused weight to bf16 by default.
    """
    d_in, d_out = w_mean.shape
    n = 2 * d_out
    n_pad = _round_up(n, 128)
    k_pad = _round_up(d_in, 128)

    w = jnp.concatenate([w_mean, w_logvar], axis=1)            # (d_in, 2*d_out)
    w = jnp.pad(w, ((0, k_pad - d_in), (0, n_pad - n)))        # zero K/N padding
    bias = jnp.concatenate([b_mean, b_logvar], axis=0)
    bias = jnp.pad(bias, (0, n_pad - n)).reshape(1, n_pad).astype(jnp.float32)

    dtype = jnp.bfloat16 if use_bf16 else jnp.float32
    return dict(w=w.astype(dtype), bias=bias, d_in=d_in, d_out=d_out)


def _flow_theory_kernel(x_ref, w_ref, b_ref, out_ref, acc_ref):
    k = pl.program_id(1)

    @pl.when(k == 0)
    def _init():
        acc_ref[...] = jnp.zeros_like(acc_ref)

    acc_ref[...] += jnp.dot(x_ref[...], w_ref[...],
                            preferred_element_type=jnp.float32)

    @pl.when(k == pl.num_programs(1) - 1)
    def _finalize():
        out_ref[...] = (acc_ref[...] + b_ref[...]).astype(out_ref.dtype)


def flow_theory_forward(x, params, *, block_b: int = 1024):
    """x: (..., D_in). Returns (mean, log_var), each (..., D_out)."""
    w, bias = params["w"], params["bias"]
    d_in, d_out = params["d_in"], params["d_out"]
    k_pad, n_pad = w.shape
    dtype = w.dtype
    itemsize = jnp.dtype(dtype).itemsize
    mult = 16 if dtype == jnp.bfloat16 else 8        # sublane multiple
    block_b = max(mult, (block_b // mult) * mult)

    lead_shape = x.shape[:-1]
    assert x.shape[-1] == d_in, f"expected last dim {d_in}, got {x.shape[-1]}"
    x = x.reshape(-1, d_in).astype(dtype)
    B = x.shape[0]
    if k_pad != d_in:
        x = jnp.pad(x, ((0, 0), (0, k_pad - d_in)))  # zero K padding (per call)

    budget = _vmem_budget_bytes()

    # ---- K (D_in) tiling: W resident when it fits, otherwise stream it ------
    w_budget = budget // 2
    if k_pad * n_pad * itemsize <= w_budget:
        tk, w_bufs = k_pad, 1                        # resident, single buffer
    else:
        # TODO(synk): also tile N when even a 128-row K slab of W doesn't fit.
        tk, w_bufs = 128, 2
        m = k_pad // 128
        for d in range(1, m + 1):
            if m % d == 0 and 2 * (128 * d) * n_pad * itemsize <= w_budget:
                tk = 128 * d
    nk = k_pad // tk

    # ---- Batch tile from the remaining VMEM budget ---------------------------
    w_vmem = w_bufs * tk * n_pad * itemsize + 2 * n_pad * 4     # W + bias
    per_row = 2 * tk * itemsize + 2 * n_pad * itemsize + n_pad * 4  # x, out, acc
    tm_max = max(mult, (max(budget - w_vmem, 0) // per_row) // mult * mult)
    tm = min(block_b, tm_max, _round_up(B, mult))
    if tm >= 256:
        tm = (tm // 256) * 256                       # keep the 256-wide MXU fed
    b_pad = _round_up(B, tm)
    if b_pad // tm == 1 and B > mult:
        # Guarantee >=2 "parallel" steps so both v7x TensorCores get work.
        tm = _round_up(pl.cdiv(B, 2), mult)
        b_pad = _round_up(B, tm)
    nb = b_pad // tm
    if b_pad != B:
        x = jnp.pad(x, ((0, b_pad - B), (0, 0)))

    def call(single_buffer_consts: bool):
        kw_const = {"pipeline_mode": pl.Buffered(1)} if single_buffer_consts else {}
        kw_w = kw_const if nk == 1 else {}           # W index varies only when K tiled
        return pl.pallas_call(
            _flow_theory_kernel,
            out_shape=jax.ShapeDtypeStruct((b_pad, n_pad), dtype),
            grid=(nb, nk),
            in_specs=[
                pl.BlockSpec((tm, tk), lambda i, k: (i, k)),              # x tile
                pl.BlockSpec((tk, n_pad), lambda i, k: (k, 0), **kw_w),   # fused W
                pl.BlockSpec((1, n_pad), lambda i, k: (0, 0), **kw_const),  # bias
            ],
            out_specs=pl.BlockSpec((tm, n_pad), lambda i, k: (i, 0)),
            scratch_shapes=[pltpu.VMEM((tm, n_pad), jnp.float32)],
            compiler_params=pltpu.CompilerParams(
                dimension_semantics=("parallel", "arbitrary"),
                vmem_limit_bytes=budget,
            ),
        )(x, w, bias)

    try:
        out = call(True)       # constant-index W / bias single-buffered
    except Exception:
        out = call(False)      # fallback if pipeline_mode is unavailable

    mean = out[:B, :d_out].reshape(*lead_shape, d_out)
    log_var = out[:B, d_out:2 * d_out].reshape(*lead_shape, d_out)
    return mean, log_var


def init_flow_theory_params(key, input_dim, output_dim, dtype=jnp.float32):
    """Deterministic init mimicking nn.Linear (uniform +-1/sqrt(fan_in))."""
    k1, k2, k3, k4 = jax.random.split(key, 4)
    bound = 1.0 / (input_dim ** 0.5)
    w_mean = jax.random.uniform(k1, (input_dim, output_dim), dtype, -bound, bound)
    b_mean = jax.random.uniform(k2, (output_dim,), dtype, -bound, bound)
    w_logvar = jax.random.uniform(k3, (input_dim, output_dim), dtype, -bound, bound)
    b_logvar = jax.random.uniform(k4, (output_dim,), dtype, -bound, bound)
    return w_mean, b_mean, w_logvar, b_logvar


if __name__ == "__main__":
    key = jax.random.PRNGKey(0)
    B, D_in, D_out = 8, 32, 16

    k_x, k_p = jax.random.split(key)
    x = jax.random.normal(k_x, (B, D_in), jnp.float32)
    w_mean, b_mean, w_logvar, b_logvar = init_flow_theory_params(k_p, D_in, D_out)

    hi = jax.lax.Precision.HIGHEST

    # --- f32 path: tight check against a high-precision reference ------------
    params_f32 = prepare_flow_theory(w_mean, b_mean, w_logvar, b_logvar,
                                     use_bf16=False)
    mean, log_var = flow_theory_forward(x, params_f32)
    jax.block_until_ready((mean, log_var))
    ref_mean = jnp.dot(x, w_mean, precision=hi) + b_mean
    ref_logvar = jnp.dot(x, w_logvar, precision=hi) + b_logvar
    assert mean.shape == (B, D_out) and log_var.shape == (B, D_out)
    assert jnp.allclose(mean, ref_mean, atol=5e-3, rtol=5e-3), "f32 mean mismatch"
    assert jnp.allclose(log_var, ref_logvar, atol=5e-3, rtol=5e-3), "f32 log_var mismatch"

    # --- default bf16 path: check against a bf16-quantized reference ---------
    params_bf16 = prepare_flow_theory(w_mean, b_mean, w_logvar, b_logvar)
    mean_bf, logvar_bf = flow_theory_forward(x, params_bf16)
    jax.block_until_ready((mean_bf, logvar_bf))
    xq = x.astype(jnp.bfloat16).astype(jnp.float32)
    wmq = w_mean.astype(jnp.bfloat16).astype(jnp.float32)
    wvq = w_logvar.astype(jnp.bfloat16).astype(jnp.float32)
    ref_mean_bf = jnp.dot(xq, wmq, precision=hi) + b_mean
    ref_logvar_bf = jnp.dot(xq, wvq, precision=hi) + b_logvar
    assert mean_bf.shape == (B, D_out) and logvar_bf.shape == (B, D_out)
    assert jnp.allclose(mean_bf.astype(jnp.float32), ref_mean_bf,
                        atol=5e-2, rtol=5e-2), "bf16 mean mismatch"
    assert jnp.allclose(logvar_bf.astype(jnp.float32), ref_logvar_bf,
                        atol=5e-2, rtol=5e-2), "bf16 log_var mismatch"

    print("KERNEL_OK")
</pallas_src>

<mosaic_0001>
module attributes {stable_mosaic.version = 11 : i64} {
  func.func @_flow_theory_kernel(%arg0: i32, %arg1: i32, %arg2: memref<8x128xf32, #tpu.memory_space<vmem>>, %arg3: memref<128x128xf32, #tpu.memory_space<vmem>>, %arg4: memref<1x128xf32, #tpu.memory_space<vmem>>, %arg5: memref<8x128xf32, #tpu.memory_space<vmem>>, %arg6: memref<8x128xf32, #tpu.memory_space<vmem>>) attributes {dimension_semantics = [#tpu.dimension_semantics<parallel>, #tpu.dimension_semantics<arbitrary>], iteration_bounds = array<i64: 1, 1>, scalar_prefetch = 0 : i64, scratch_operands = 1 : i64, tpu.core_type = #tpu.core_type<tc>, window_params = [{transform_indices = @transform_0, window_bounds = array<i64: 8, 128>}, {pipeline_mode = #tpu.pipeline_mode<synchronous>, transform_indices = @transform_1, window_bounds = array<i64: 128, 128>}, {pipeline_mode = #tpu.pipeline_mode<synchronous>, transform_indices = @transform_2, window_bounds = array<i64: 1, 128>}, {transform_indices = @transform_3, window_bounds = array<i64: 8, 128>}]} {
    %c0_i32 = arith.constant 0 : i32
    %0 = arith.cmpi eq, %arg1, %c0_i32 : i32
    %1 = arith.extui %0 : i1 to i32
    %c0_i32_0 = arith.constant 0 : i32
    %2 = arith.cmpi ne, %1, %c0_i32_0 : i32
    scf.if %2 {
      %cst_10 = arith.constant 0.000000e+00 : f32
      %12 = vector.broadcast %cst_10 : f32 to vector<8x128xf32>
      %c0_11 = arith.constant 0 : index
      %c0_12 = arith.constant 0 : index
      %13 = vector.load %arg6[%c0_11, %c0_12] : memref<8x128xf32, #tpu.memory_space<vmem>>, vector<8x128xf32>
      tpu.vector_store %arg6[%c0_11, %c0_12], %12 {strides = array<i32>} : memref<8x128xf32, #tpu.memory_space<vmem>>, vector<8x128xf32>,
    } else {
    }
    %c0 = arith.constant 0 : index
    %c0_1 = arith.constant 0 : index
    %3 = vector.load %arg6[%c0, %c0_1] : memref<8x128xf32, #tpu.memory_space<vmem>>, vector<8x128xf32>
    %c0_2 = arith.constant 0 : index
    %c0_3 = arith.constant 0 : index
    %4 = vector.load %arg2[%c0_2, %c0_3] : memref<8x128xf32, #tpu.memory_space<vmem>>, vector<8x128xf32>
    %c0_4 = arith.constant 0 : index
    %c0_5 = arith.constant 0 : index
    %5 = vector.load %arg3[%c0_4, %c0_5] : memref<128x128xf32, #tpu.memory_space<vmem>>, vector<128x128xf32>
    %cst = arith.constant dense<0.000000e+00> : vector<8x128xf32>
    %6 = tpu.matmul %4, %5, %cst {dimension_numbers = #tpu.dot_dimension_numbers<[1], [0], [0], [1], [0, 0, 1, 1], [], []>} : vector<8x128xf32>, vector<128x128xf32>, vector<8x128xf32> -> vector<8x128xf32>
    %7 = arith.addf %3, %6 : vector<8x128xf32>
    %c0_6 = arith.constant 0 : index
    %c0_7 = arith.constant 0 : index
    %8 = vector.load %arg6[%c0_6, %c0_7] : memref<8x128xf32, #tpu.memory_space<vmem>>, vector<8x128xf32>
    tpu.vector_store %arg6[%c0_6, %c0_7], %7 {strides = array<i32>} : memref<8x128xf32, #tpu.memory_space<vmem>>, vector<8x128xf32>,
    %c0_i32_8 = arith.constant 0 : i32
    %9 = arith.cmpi eq, %arg1, %c0_i32_8 : i32
    %10 = arith.extui %9 : i1 to i32
    %c0_i32_9 = arith.constant 0 : i32
    %11 = arith.cmpi ne, %10, %c0_i32_9 : i32
    scf.if %11 {
      %c0_10 = arith.constant 0 : index
      %c0_11 = arith.constant 0 : index
      %12 = vector.load %arg6[%c0_10, %c0_11] : memref<8x128xf32, #tpu.memory_space<vmem>>, vector<8x128xf32>
      %c0_12 = arith.constant 0 : index
      %c0_13 = arith.constant 0 : index
      %13 = vector.load %arg4[%c0_12, %c0_13] : memref<1x128xf32, #tpu.memory_space<vmem>>, vector<1x128xf32>
      %14 = vector.broadcast %13 : vector<1x128xf32> to vector<8x128xf32>
      %15 = arith.addf %12, %14 : vector<8x128xf32>
      %c0_14 = arith.constant 0 : index
      %c0_15 = arith.constant 0 : index
      %16 = vector.load %arg5[%c0_14, %c0_15] : memref<8x128xf32, #tpu.memory_space<vmem>>, vector<8x128xf32>
      tpu.vector_store %arg5[%c0_14, %c0_15], %15 {strides = array<i32>} : memref<8x128xf32, #tpu.memory_space<vmem>>, vector<8x128xf32>,
    } else {
    }
    return
  }
  func.func @transform_0(%arg0: i32, %arg1: i32) -> (i32, i32) {
    %c0_i32 = arith.constant 0 : i32
    return %arg0, %arg1 : i32, i32
  }
  func.func @transform_1(%arg0: i32, %arg1: i32) -> (i32, i32) {
    %c0_i32 = arith.constant 0 : i32
    %c0_i32_0 = arith.constant 0 : i32
    return %arg1, %c0_i32 : i32, i32
  }
  func.func @transform_2(%arg0: i32, %arg1: i32) -> (i32, i32) {
    %c0_i32 = arith.constant 0 : i32
    %c0_i32_0 = arith.constant 0 : i32
    %c0_i32_1 = arith.constant 0 : i32
    return %c0_i32, %c0_i32_0 : i32, i32
  }
  func.func @transform_3(%arg0: i32, %arg1: i32) -> (i32, i32) {
    %c0_i32 = arith.constant 0 : i32
    %c0_i32_0 = arith.constant 0 : i32
    return %arg0, %c0_i32 : i32, i32
  }
}

module attributes {stable_mosaic.version = 11 : i64} {
  func.func @_flow_theory_kernel(%arg0: i32, %arg1: i32, %arg2: memref<8x128xf32, #tpu.memory_space<vmem>>, %arg3: memref<128x128xf32, #tpu.memory_space<vmem>>, %arg4: memref<1x128xf32, #tpu.memory_space<vmem>>, %arg5: memref<8x128xf32, #tpu.memory_space<vmem>>, %arg6: memref<8x128xf32, #tpu.memory_space<vmem>>) attributes {dimension_semantics = [#tpu.dimension_semantics<parallel>, #tpu.dimension_semantics<arbitrary>], iteration_bounds = array<i64: 1, 1>, scalar_prefetch = 0 : i64, scratch_operands = 1 : i64, tpu.core_type = #tpu.core_type<tc>, window_params = [{transform_indices = @transform_0, window_bounds = array<i64: 8, 128>}, {transform_indices = @transform_1, window_bounds = array<i64: 128, 128>}, {pipeline_mode = #tpu.pipeline_mode<synchronous>, transform_indices = @transform_2, window_bounds = array<i64: 1, 128>}, {transform_indices = @transform_3, window_bounds = array<i64: 8, 128>}]} {
    %c0_i32 = arith.constant 0 : i32
    %0 = arith.cmpi eq, %arg1, %c0_i32 : i32
    %1 = arith.extui %0 : i1 to i32
    %c0_i32_0 = arith.constant 0 : i32
    %2 = arith.cmpi ne, %1, %c0_i32_0 : i32
    scf.if %2 {
      %cst_10 = arith.constant 0.000000e+00 : f32
      %12 = vector.broadcast %cst_10 : f32 to vector<8x128xf32>
      %c0_11 = arith.constant 0 : index
      %c0_12 = arith.constant 0 : index
      %13 = vector.load %arg6[%c0_11, %c0_12] : memref<8x128xf32, #tpu.memory_space<vmem>>, vector<8x128xf32>
      tpu.vector_store %arg6[%c0_11, %c0_12], %12 {strides = array<i32>} : memref<8x128xf32, #tpu.memory_space<vmem>>, vector<8x128xf32>,
    } else {
    }
    %c0 = arith.constant 0 : index
    %c0_1 = arith.constant 0 : index
    %3 = vector.load %arg6[%c0, %c0_1] : memref<8x128xf32, #tpu.memory_space<vmem>>, vector<8x128xf32>
    %c0_2 = arith.constant 0 : index
    %c0_3 = arith.constant 0 : index
    %4 = vector.load %arg2[%c0_2, %c0_3] : memref<8x128xf32, #tpu.memory_space<vmem>>, vector<8x128xf32>
    %c0_4 = arith.constant 0 : index
    %c0_5 = arith.constant 0 : index
    %5 = vector.load %arg3[%c0_4, %c0_5] : memref<128x128xf32, #tpu.memory_space<vmem>>, vector<128x128xf32>
    %cst = arith.constant dense<0.000000e+00> : vector<8x128xf32>
    %6 = tpu.matmul %4, %5, %cst {dimension_numbers = #tpu.dot_dimension_numbers<[1], [0], [0], [1], [0, 0, 1, 1], [], []>} : vector<8x128xf32>, vector<128x128xf32>, vector<8x128xf32> -> vector<8x128xf32>
    %7 = arith.addf %3, %6 : vector<8x128xf32>
    %c0_6 = arith.constant 0 : index
    %c0_7 = arith.constant 0 : index
    %8 = vector.load %arg6[%c0_6, %c0_7] : memref<8x128xf32, #tpu.memory_space<vmem>>, vector<8x128xf32>
    tpu.vector_store %arg6[%c0_6, %c0_7], %7 {strides = array<i32>} : memref<8x128xf32, #tpu.memory_space<vmem>>, vector<8x128xf32>,
    %c0_i32_8 = arith.constant 0 : i32
    %9 = arith.cmpi eq, %arg1, %c0_i32_8 : i32
    %10 = arith.extui %9 : i1 to i32
    %c0_i32_9 = arith.constant 0 : i32
    %11 = arith.cmpi ne, %10, %c0_i32_9 : i32
    scf.if %11 {
      %c0_10 = arith.constant 0 : index
      %c0_11 = arith.constant 0 : index
      %12 = vector.load %arg6[%c0_10, %c0_11] : memref<8x128xf32, #tpu.memory_space<vmem>>, vector<8x128xf32>
      %c0_12 = arith.constant 0 : index
      %c0_13 = arith.constant 0 : index
      %13 = vector.load %arg4[%c0_12, %c0_13] : memref<1x128xf32, #tpu.memory_space<vmem>>, vector<1x128xf32>
      %14 = vector.broadcast %13 : vector<1x128xf32> to vector<8x128xf32>
      %15 = arith.addf %12, %14 : vector<8x128xf32>
      %c0_14 = arith.constant 0 : index
      %c0_15 = arith.constant 0 : index
      %16 = vector.load %arg5[%c0_14, %c0_15] : memref<8x128xf32, #tpu.memory_space<vmem>>, vector<8x128xf32>
      tpu.vector_store %arg5[%c0_14, %c0_15], %15 {strides = array<i32>} : memref<8x128xf32, #tpu.memory_space<vmem>>, vector<8x128xf32>,
    } else {
    }
    return
  }
  func.func @transform_0(%arg0: i32, %arg1: i32) -> (i32, i32) {
    %c0_i32 = arith.constant 0 : i32
    return %arg0, %arg1 : i32, i32
  }
  func.func @transform_1(%arg0: i32, %arg1: i32) -> (i32, i32) {
    %c0_i32 = arith.constant 0 : i32
    %c0_i32_0 = arith.constant 0 : i32
    return %arg1, %c0_i32 : i32, i32
  }
  func.func @transform_2(%arg0: i32, %arg1: i32) -> (i32, i32) {
    %c0_i32 = arith.constant 0 : i32
    %c0_i32_0 = arith.constant 0 : i32
    %c0_i32_1 = arith.constant 0 : i32
    return %c0_i32, %c0_i32_0 : i32, i32
  }
  func.func @transform_3(%arg0: i32, %arg1: i32) -> (i32, i32) {
    %c0_i32 = arith.constant 0 : i32
    %c0_i32_0 = arith.constant 0 : i32
    return %arg0, %c0_i32 : i32, i32
  }
}

</mosaic_0001>

<bundles_post_ra>
// kernel: tpu_custom_call.1
= control target key start
LH: loop header
LB: loop body
LE: loop exit
PB: predicated region body
PF: predicated region fallthrough
CT: control target
= control target key end

     0   :  { %8 = vsyncpa [#allocation4], 0  ;;  %s239_s0 = inlined_call_operand.hbm [shape: f32[8,128], index: 0, kind: input, shape index: {}]   ;;  %s240_s1 = inlined_call_operand.hbm [shape: f32[128,128], index: 1, kind: input, shape index: {}]   ;;  %s241_s2 = inlined_call_operand.vmem [shape: f32[1,128], index: 2, kind: input, shape index: {}]   ;;  %s242_s3 = inlined_call_operand.hbm [shape: f32[8,128], index: 3, kind: output, shape index: {}]  }
   0x1   :  { %9 = vsyncpa [#allocation7], 0 }
   0x2   :  { %10 = vsyncpa [#allocation5], 0  ;;  %s16_s14 = sshll.u32 %s239_s0, 4  ;;  %s202_s15 = smov [#allocation3]   ;;  %s17_s14 = int_to_ptr.hbm [resolvable:$true] %s16_s14 }
   0x3   :  { %s18_s16 = sshll.u32 %s202_s15, 4  ;;  %s26_s19 = sshll.u32 %s240_s1, 4  ;;  %s19_s16 = int_to_ptr.vmem [resolvable:$true] %s18_s16  ;;  %s27_s19 = int_to_ptr.hbm [resolvable:$true] %s26_s19 }
   0x4   :  { %21 = dma.hbm_to_vmem [thread:$0]  %s17_s14, 128, %s19_s16, [#allocation4]  }
   0x5   :  { %s203_s20 = smov [#allocation6]   ;;  %s204_s22 = smov 128  }
   0x6   :  { %s28_s21 = sshll.u32 %s203_s20, 4  ;;  %s205_s23 = smov 8   ;;  %s29_s21 = int_to_ptr.vmem [resolvable:$true] %s28_s21 }
   0x7   :  { %34 = dma.hbm_to_vmem [thread:$0]  %s27_s19, 2048, %s29_s21, [#allocation7], %s204_s22, %s204_s22, %s205_s23  }
   0x8   :  { %196 = dma.done.wait [#allocation4], 128  }
   0x9   :  { %197 = vsyncadd [#allocation4], 4294967168 }
   0xa   :  { %198 = dma.done.wait [#allocation7], 2048  }
   0xb   :  { %199 = vsyncadd [#allocation7], 4294965248  ;;  %v67_v0 = vld [vmem:[#allocation6 + $0x78] sm:$0xff]  ;;  %v66_v1 = vld [vmem:[#allocation6 + $0x70] sm:$0xff]  ;;  %s206_s24 = smov [#allocation8]   ;;  %s107_s28 = sshll.u32 %s242_s3, 4  ;;  %s108_s28 = int_to_ptr.hbm [resolvable:$true] %s107_s28 }
   0xc   :  { %68 = vmatpush.msra.mxu0 %v67_v0  ;;  %v65_v2 = vld [vmem:[#allocation6 + $0x68] sm:$0xff]  ;;  %v64_v3 = vld [vmem:[#allocation6 + $0x60] sm:$0xff]  ;;  %v63_v4 = vld [vmem:[#allocation6 + $0x58] sm:$0xff]  ;;  %s105_s25 = sshll.u32 %s206_s24, 4  ;;  %s106_s25 = int_to_ptr.vmem [resolvable:$true] %s105_s25 }
   0xd   :  { %v62_v5 = vld [vmem:[#allocation6 + $0x50] sm:$0xff]  ;;  %v61_v6 = vld [vmem:[#allocation6 + $0x48] sm:$0xff]  ;;  %v60_v7 = vld [vmem:[#allocation6 + $0x40] sm:$0xff] }
   0xe   :  { %69 = vmatpush.msra.mxu0 %v66_v1  ;;  %v59_v8 = vld [vmem:[#allocation6 + $0x38] sm:$0xff]  ;;  %v58_v9 = vld [vmem:[#allocation6 + $0x30] sm:$0xff]  ;;  %v57_v10 = vld [vmem:[#allocation6 + $0x28] sm:$0xff] }
   0xf   :  { %v56_v11 = vld [vmem:[#allocation6 + $0x20] sm:$0xff]  ;;  %v55_v12 = vld [vmem:[#allocation6 + $0x18] sm:$0xff]  ;;  %v54_v13 = vld [vmem:[#allocation6 + $0x10] sm:$0xff] }
  0x10   :  { %70 = vmatpush.msra.mxu0 %v65_v2  ;;  %v53_v14 = vld [vmem:[#allocation6 + $0x8] sm:$0xff]  ;;  %v52_v15 = vld [vmem:[#allocation6] sm:$0xff]  ;;  %v51_v16 = vld [vmem:[#allocation3] sm:$0xff] }
  0x11   :  { %v123_v17 = vld [vmem:[%s241_s2] ss:$0 sm:$0xff] }
  0x12   :  { %71 = vmatpush.msra.mxu0 %v64_v3 }
  0x14   :  { %72 = vmatpush.msra.mxu0 %v63_v4 }
  0x16   :  { %73 = vmatpush.msra.mxu0 %v62_v5 }
  0x18   :  { %74 = vmatpush.msra.mxu0 %v61_v6 }
  0x1a   :  { %75 = vmatpush.msra.mxu0 %v60_v7 }
  0x1c   :  { %76 = vmatpush.msra.mxu0 %v59_v8 }
  0x1e   :  { %77 = vmatpush.msra.mxu0 %v58_v9 }
  0x20   :  { %78 = vmatpush.msra.mxu0 %v57_v10 }
  0x22   :  { %79 = vmatpush.msra.mxu0 %v56_v11 }
  0x24   :  { %80 = vmatpush.msra.mxu0 %v55_v12 }
  0x26   :  { %81 = vmatpush.msra.mxu0 %v54_v13 }
  0x28   :  { %82 = vmatpush.msra.mxu0 %v53_v14 }
  0x2a   :  { %83 = vmatpush.msra.mxu0 %v52_v15 }
  0x2b   :  { %84 = vmatmul.f32.vlgmr.msra.gmra.mxu0 %v51_v16 }
  0xa8   :  { %v85_v18 = vpop.f32.mrf.mxu0 }
  0xa9   :  { %v98_v19 = vadd.f32 %v123_v17, %v85_v18 }
  0xab   :  { %99 = vst [vmem:[#allocation8] sm:$0xff] %v98_v19 }
  0xac   :  { %110 = dma.vmem_to_hbm [thread:$0]  %s106_s25, 128, %s108_s28, [#allocation5]  }
  0xad   :  { %200 = dma.done.wait [#allocation5], 128  }
  0xae   :  { %201 = vsyncadd [#allocation5], 4294967168 }
  0xaf   :  { %115 = vsyncpa [#allocation4], 1 }
  0xb0   :  { %116 = vsyncpa [#allocation7], 1 }
  0xb1   :  { %117 = vsyncpa [#allocation5], 1 }

// kernel: tpu_custom_call.1
= control target key start
LH: loop header
LB: loop body
LE: loop exit
PB: predicated region body
PF: predicated region fallthrough
CT: control target
= control target key end

     0   :  { %8 = vsyncpa [#allocation4], 0  ;;  %s239_s0 = inlined_call_operand.hbm [shape: f32[8,128], index: 0, kind: input, shape index: {}]   ;;  %s240_s1 = inlined_call_operand.hbm [shape: f32[128,128], index: 1, kind: input, shape index: {}]   ;;  %s241_s2 = inlined_call_operand.vmem [shape: f32[1,128], index: 2, kind: input, shape index: {}]   ;;  %s242_s3 = inlined_call_operand.hbm [shape: f32[8,128], index: 3, kind: output, shape index: {}]  }
   0x1   :  { %9 = vsyncpa [#allocation7], 0 }
   0x2   :  { %10 = vsyncpa [#allocation5], 0  ;;  %s16_s14 = sshll.u32 %s239_s0, 4  ;;  %s202_s15 = smov [#allocation3]   ;;  %s17_s14 = int_to_ptr.hbm [resolvable:$true] %s16_s14 }
   0x3   :  { %s18_s16 = sshll.u32 %s202_s15, 4  ;;  %s26_s19 = sshll.u32 %s240_s1, 4  ;;  %s19_s16 = int_to_ptr.vmem [resolvable:$true] %s18_s16  ;;  %s27_s19 = int_to_ptr.hbm [resolvable:$true] %s26_s19 }
   0x4   :  { %21 = dma.hbm_to_vmem [thread:$0]  %s17_s14, 128, %s19_s16, [#allocation4]  }
   0x5   :  { %s203_s20 = smov [#allocation6]   ;;  %s204_s22 = smov 128  }
   0x6   :  { %s28_s21 = sshll.u32 %s203_s20, 4  ;;  %s205_s23 = smov 8   ;;  %s29_s21 = int_to_ptr.vmem [resolvable:$true] %s28_s21 }
   0x7   :  { %34 = dma.hbm_to_vmem [thread:$0]  %s27_s19, 2048, %s29_s21, [#allocation7], %s204_s22, %s204_s22, %s205_s23  }
   0x8   :  { %196 = dma.done.wait [#allocation4], 128  }
   0x9   :  { %197 = vsyncadd [#allocation4], 4294967168 }
   0xa   :  { %198 = dma.done.wait [#allocation7], 2048  }
   0xb   :  { %199 = vsyncadd [#allocation7], 4294965248  ;;  %v67_v0 = vld [vmem:[#allocation6 + $0x78] sm:$0xff]  ;;  %v66_v1 = vld [vmem:[#allocation6 + $0x70] sm:$0xff]  ;;  %s206_s24 = smov [#allocation8]   ;;  %s107_s28 = sshll.u32 %s242_s3, 4  ;;  %s108_s28 = int_to_ptr.hbm [resolvable:$true] %s107_s28 }
   0xc   :  { %68 = vmatpush.msra.mxu0 %v67_v0  ;;  %v65_v2 = vld [vmem:[#allocation6 + $0x68] sm:$0xff]  ;;  %v64_v3 = vld [vmem:[#allocation6 + $0x60] sm:$0xff]  ;;  %v63_v4 = vld [vmem:[#allocation6 + $0x58] sm:$0xff]  ;;  %s105_s25 = sshll.u32 %s206_s24, 4  ;;  %s106_s25 = int_to_ptr.vmem [resolvable:$true] %s105_s25 }
   0xd   :  { %v62_v5 = vld [vmem:[#allocation6 + $0x50] sm:$0xff]  ;;  %v61_v6 = vld [vmem:[#allocation6 + $0x48] sm:$0xff]  ;;  %v60_v7 = vld [vmem:[#allocation6 + $0x40] sm:$0xff] }
   0xe   :  { %69 = vmatpush.msra.mxu0 %v66_v1  ;;  %v59_v8 = vld [vmem:[#allocation6 + $0x38] sm:$0xff]  ;;  %v58_v9 = vld [vmem:[#allocation6 + $0x30] sm:$0xff]  ;;  %v57_v10 = vld [vmem:[#allocation6 + $0x28] sm:$0xff] }
   0xf   :  { %v56_v11 = vld [vmem:[#allocation6 + $0x20] sm:$0xff]  ;;  %v55_v12 = vld [vmem:[#allocation6 + $0x18] sm:$0xff]  ;;  %v54_v13 = vld [vmem:[#allocation6 + $0x10] sm:$0xff] }
  0x10   :  { %70 = vmatpush.msra.mxu0 %v65_v2  ;;  %v53_v14 = vld [vmem:[#allocation6 + $0x8] sm:$0xff]  ;;  %v52_v15 = vld [vmem:[#allocation6] sm:$0xff]  ;;  %v51_v16 = vld [vmem:[#allocation3] sm:$0xff] }
  0x11   :  { %v123_v17 = vld [vmem:[%s241_s2] ss:$0 sm:$0xff] }
  0x12   :  { %71 = vmatpush.msra.mxu0 %v64_v3 }
  0x14   :  { %72 = vmatpush.msra.mxu0 %v63_v4 }
  0x16   :  { %73 = vmatpush.msra.mxu0 %v62_v5 }
  0x18   :  { %74 = vmatpush.msra.mxu0 %v61_v6 }
  0x1a   :  { %75 = vmatpush.msra.mxu0 %v60_v7 }
  0x1c   :  { %76 = vmatpush.msra.mxu0 %v59_v8 }
  0x1e   :  { %77 = vmatpush.msra.mxu0 %v58_v9 }
  0x20   :  { %78 = vmatpush.msra.mxu0 %v57_v10 }
  0x22   :  { %79 = vmatpush.msra.mxu0 %v56_v11 }
  0x24   :  { %80 = vmatpush.msra.mxu0 %v55_v12 }
  0x26   :  { %81 = vmatpush.msra.mxu0 %v54_v13 }
  0x28   :  { %82 = vmatpush.msra.mxu0 %v53_v14 }
  0x2a   :  { %83 = vmatpush.msra.mxu0 %v52_v15 }
  0x2b   :  { %84 = vmatmul.f32.vlgmr.msra.gmra.mxu0 %v51_v16 }
  0xa8   :  { %v85_v18 = vpop.f32.mrf.mxu0 }
  0xa9   :  { %v98_v19 = vadd.f32 %v123_v17, %v85_v18 }
  0xab   :  { %99 = vst [vmem:[#allocation8] sm:$0xff] %v98_v19 }
  0xac   :  { %110 = dma.vmem_to_hbm [thread:$0]  %s106_s25, 128, %s108_s28, [#allocation5]  }
  0xad   :  { %200 = dma.done.wait [#allocation5], 128  }
  0xae   :  { %201 = vsyncadd [#allocation5], 4294967168 }
  0xaf   :  { %115 = vsyncpa [#allocation4], 1 }
  0xb0   :  { %116 = vsyncpa [#allocation7], 1 }
  0xb1   :  { %117 = vsyncpa [#allocation5], 1 }

</bundles_post_ra>
